<compile_context>
chip_gen: v7x
topology: tpu7x:2x2x1
jax: 0.10.0
libtpu: 0.0.40
codegen_flags: <defaults>
</compile_context>

<pallas_src>
import functools

import jax
import jax.numpy as jnp
from jax import lax
from jax.experimental import pallas as pl
from jax.experimental.pallas import tpu as pltpu


def _round_up(x, m):
    return (x + m - 1) // m * m


def _ipow(x, m):
    """x ** m for a static integer m >= 1 via square-and-multiply (trace-time)."""
    result = None
    base = x
    e = int(m)
    while e > 0:
        if e & 1:
            result = base if result is None else result * base
        e >>= 1
        if e:
            base = base * base
    return result


def _pick_tiles(n):
    """Row/col tile sizes driven by MXU / lane utilisation."""
    if n <= 128:
        return n, n          # one full-extent N x N tile
    if n <= 512:
        return 128, 256      # num_i >= 2 keeps both v7x TensorCores busy
    return 256, 256


def _mmd_tile_kernel(scales_ref, sqr_ref, sqc_ref, xr_ref, xc_ref, out_ref,
                     *scratch, batch_size, n_valid, tm, tn,
                     kernel_mul, kernel_num, nk):
    i = pl.program_id(0)
    j = pl.program_id(1)
    nj = pl.num_programs(1)

    if nk > 1:
        gram_ref, acc_ref = scratch
        k = pl.program_id(2)
        first = jnp.logical_and(j == 0, k == 0)
        last = jnp.logical_and(j == nj - 1, k == nk - 1)
    else:
        (acc_ref,) = scratch
        first = j == 0
        last = j == nj - 1

    # New row-tile sweep: reset this row tile's signed kernel-sum accumulator.
    @pl.when(first)
    def _():
        acc_ref[...] = jnp.zeros_like(acc_ref)

    def cross():
        # MXU: x_r . x_c^T, contracting the last dim of both (no transpose).
        return lax.dot_general(
            xr_ref[...], xc_ref[...],
            dimension_numbers=(((1,), (1,)), ((), ())),
            preferred_element_type=jnp.float32)

    if nk > 1:
        @pl.when(k == 0)
        def _():
            gram_ref[...] = jnp.zeros_like(gram_ref)
        gram_ref[...] += cross()

    def epilogue():
        g = gram_ref[...] if nk > 1 else cross()
        # ||x_r - x_c||^2 ; clamp tiny fp-cancellation negatives (diagonal).
        l2 = jnp.maximum(sqr_ref[...] + sqc_ref[...] - 2.0 * g, 0.0)

        im = int(kernel_mul)
        if float(kernel_mul) == float(im) and im >= 2:
            # Single exp (largest bandwidth); remaining scales via repeated
            # integer powers on the VALU (EUP issues 1 exp per element).
            cur = jnp.exp(l2 * scales_ref[0, kernel_num - 1])
            ksum = cur
            for _ in range(kernel_num - 1):
                cur = _ipow(cur, im)
                ksum = ksum + cur
        else:
            # General path: hoisted -1/bw_s scalars -> multiplies, no divides.
            ksum = jnp.exp(l2 * scales_ref[0, 0])
            for s in range(1, kernel_num):
                ksum = ksum + jnp.exp(l2 * scales_ref[0, s])

        # Per-element quadrant sign + padding mask (cheap VPU filler hidden
        # under the exp / MXU bottleneck).
        rows = i * tm + lax.broadcasted_iota(jnp.int32, (tm, tn), 0)
        cols = j * tn + lax.broadcasted_iota(jnp.int32, (tm, tn), 1)
        in_src_r = rows < batch_size
        in_src_c = cols < batch_size
        sgn = jnp.where(jnp.logical_xor(in_src_r, in_src_c), -1.0, 1.0)
        valid = jnp.logical_and(rows < n_valid, cols < n_valid)
        w = jnp.where(valid, sgn, 0.0)
        acc_ref[...] += jnp.reshape(jnp.sum(ksum * w), (1, 1))

    if nk > 1:
        pl.when(k == nk - 1)(epilogue)
    else:
        epilogue()

    # Last step of this row-tile sweep: emit the partial (unnormalised) sum.
    @pl.when(last)
    def _():
        out_ref[...] = jnp.reshape(acc_ref[...], (1, 1, 1))


def mmd_loss_rbf(source, target, kernel_mul=2.0, kernel_num=5, fix_sigma=None,
                 _dk_cap=None):
    """Pallas implementation of MMD_loss(kernel_type='rbf').forward."""
    assert source.shape == target.shape and source.ndim == 2
    b, d = source.shape
    n = 2 * b
    f32 = jnp.float32

    # --- O(N*D) glue: concat, centre, norms, analytic bandwidth -------------
    total = jnp.concatenate([source, target], axis=0).astype(f32)     # (n, d)
    # Pairwise distances are translation-invariant; centring improves the
    # conditioning of the analytic L2 sum and of the -2*x.y cross term.
    total = total - jnp.mean(total, axis=0, keepdims=True)

    sq = jnp.sum(total * total, axis=1)                               # (n,)
    colsum = jnp.sum(total, axis=0)                                   # (d,)
    # sum_{r,c} ||x_r - x_c||^2 = 2*n*sum_i ||x_i||^2 - 2*||sum_i x_i||^2
    sum_l2 = 2.0 * n * jnp.sum(sq) - 2.0 * jnp.dot(colsum, colsum)
    if fix_sigma is not None:
        bandwidth = jnp.asarray(fix_sigma, f32)
    else:
        bandwidth = sum_l2 / float(n * n - n)
    bandwidth = bandwidth / (kernel_mul ** (kernel_num // 2))
    # exp(-l2 / bw_s) == exp(l2 * scales[s]) with hoisted negative reciprocals.
    scales = jnp.stack(
        [-1.0 / (bandwidth * (kernel_mul ** s)) for s in range(kernel_num)]
    ).astype(f32).reshape(1, kernel_num)

    # --- tiling --------------------------------------------------------------
    tm, tn = _pick_tiles(n)
    n_pad = _round_up(n, tn)                 # tn is a multiple of tm
    num_i = n_pad // tm
    num_j = n_pad // tn

    dp0 = _round_up(max(d, 1), 128)
    # Keep the whole padded feature dim resident (nk == 1) whenever the
    # double-buffered row/col blocks fit a ~12 MiB budget; chunk otherwise.
    budget = 12 * 1024 * 1024
    dk_max = max(128, (budget // (8 * (tm + tn))) // 128 * 128)
    if _dk_cap is not None:
        dk_max = max(128, min(dk_max, _dk_cap))
    if dp0 <= dk_max:
        dk, dp = dp0, dp0
    else:
        dk = dk_max
        dp = _round_up(dp0, dk)
    nk = dp // dk

    x_p = total
    if n_pad != n or dp != d:
        x_p = jnp.pad(total, ((0, n_pad - n), (0, dp - d)))
    sq_p = jnp.pad(sq, (0, n_pad - n)) if n_pad != n else sq
    sq_col = sq_p.reshape(n_pad, 1)
    sq_row = sq_p.reshape(1, n_pad)

    scratch_shapes = [pltpu.VMEM((1, 1), jnp.float32)]        # signed-sum acc
    if nk > 1:
        scratch_shapes = [pltpu.VMEM((tm, tn), jnp.float32)] + scratch_shapes

    kernel = functools.partial(
        _mmd_tile_kernel, batch_size=b, n_valid=n, tm=tm, tn=tn,
        kernel_mul=kernel_mul, kernel_num=kernel_num, nk=nk)

    n_exp = 1 if (float(kernel_mul) == float(int(kernel_mul))
                  and int(kernel_mul) >= 2) else kernel_num
    cost = pl.CostEstimate(
        flops=int(2 * n_pad * n_pad * dp + 10 * n_pad * n_pad),
        transcendentals=int(n_pad * n_pad * n_exp),
        bytes_accessed=int(4 * (num_i * n_pad * dp + n_pad * dp
                                + 2 * n_pad + num_i)),
    )

    partials = pl.pallas_call(
        kernel,
        out_shape=jax.ShapeDtypeStruct((num_i, 1, 1), jnp.float32),
        grid_spec=pltpu.PrefetchScalarGridSpec(
            num_scalar_prefetch=0,
            grid=(num_i, num_j, nk),
            in_specs=[
                pl.BlockSpec((1, kernel_num), lambda i, j, k: (0, 0)),
                pl.BlockSpec((tm, 1), lambda i, j, k: (i, 0)),
                pl.BlockSpec((1, tn), lambda i, j, k: (0, j)),
                pl.BlockSpec((tm, dk), lambda i, j, k: (i, k)),
                pl.BlockSpec((tn, dk), lambda i, j, k: (j, k)),
            ],
            out_specs=pl.BlockSpec((1, 1, 1), lambda i, j, k: (i, 0, 0)),
            scratch_shapes=scratch_shapes,
        ),
        compiler_params=pltpu.CompilerParams(
            # Row tiles are independent -> megacore-parallel; col-tile and
            # D-chunk axes are reductions -> arbitrary, reduction last.
            dimension_semantics=("parallel", "arbitrary", "arbitrary")),
        cost_estimate=cost,
    )(scales, sq_col, sq_row, x_p, x_p)

    return jnp.sum(partials[:, 0, 0]) / float(b * b)


def _mmd_loss_rbf_ref(source, target, kernel_mul=2.0, kernel_num=5):
    """Pure-JAX reference mirroring the PyTorch module (for verification)."""
    source = source.astype(jnp.float32)
    target = target.astype(jnp.float32)
    b = source.shape[0]
    total = jnp.concatenate([source, target], axis=0)
    n = total.shape[0]
    diff = total[None, :, :] - total[:, None, :]
    l2 = jnp.sum(diff * diff, axis=2)
    bandwidth = jnp.sum(l2) / (n * n - n)
    bandwidth = bandwidth / (kernel_mul ** (kernel_num // 2))
    kernels = sum(jnp.exp(-l2 / (bandwidth * kernel_mul ** i))
                  for i in range(kernel_num))
    XX = jnp.mean(kernels[:b, :b])
    YY = jnp.mean(kernels[b:, b:])
    XY = jnp.mean(kernels[:b, b:])
    YX = jnp.mean(kernels[b:, :b])
    return XX + YY - XY - YX


if __name__ == "__main__":
    key = jax.random.PRNGKey(0)
    k1, k2, k3, k4, k5, k6, k7, k8 = jax.random.split(key, 8)

    # Small shape implied by the module (2-D feature batches).
    B, D = 8, 32
    source = jax.random.normal(k1, (B, D), dtype=jnp.float32)
    target = jax.random.normal(k2, (B, D), dtype=jnp.float32) + 0.5

    loss = jax.block_until_ready(mmd_loss_rbf(source, target))
    ref = _mmd_loss_rbf_ref(source, target)
    assert jnp.allclose(loss, ref, rtol=1e-3, atol=1e-4), (loss, ref)

    # Integer kernel_mul != 2 exercises the generalized one-exp path.
    loss3 = jax.block_until_ready(mmd_loss_rbf(source, target, kernel_mul=3.0))
    ref3 = _mmd_loss_rbf_ref(source, target, kernel_mul=3.0)
    assert jnp.allclose(loss3, ref3, rtol=1e-3, atol=1e-4), (loss3, ref3)

    # Non-integer kernel_mul exercises the multi-exp fallback.
    lossf = jax.block_until_ready(mmd_loss_rbf(source, target, kernel_mul=2.5))
    reff = _mmd_loss_rbf_ref(source, target, kernel_mul=2.5)
    assert jnp.allclose(lossf, reff, rtol=1e-3, atol=1e-4), (lossf, reff)

    # Larger feature dim: single N x N tile, whole padded D resident (nk == 1).
    B2, D2 = 32, 1500
    source2 = jax.random.normal(k3, (B2, D2), dtype=jnp.float32)
    target2 = jax.random.normal(k4, (B2, D2), dtype=jnp.float32) + 0.5
    loss2 = jax.block_until_ready(mmd_loss_rbf(source2, target2))
    ref2 = _mmd_loss_rbf_ref(source2, target2)
    assert jnp.allclose(loss2, ref2, rtol=2e-3, atol=1e-4), (loss2, ref2)

    # Batch not a multiple of the tile: multi-tile grid, tiles straddling the
    # source/target boundary, and padded rows (masked per-element weights).
    B3, D3 = 200, 96
    source3 = jax.random.normal(k5, (B3, D3), dtype=jnp.float32)
    target3 = jax.random.normal(k6, (B3, D3), dtype=jnp.float32) + 0.5
    loss4 = jax.block_until_ready(mmd_loss_rbf(source3, target3))
    ref4 = _mmd_loss_rbf_ref(source3, target3)
    assert jnp.allclose(loss4, ref4, rtol=2e-3, atol=2e-4), (loss4, ref4)

    # Forced small D-chunk cap exercises the nk > 1 gram-accumulation fallback.
    B4, D4 = 72, 300
    source4 = jax.random.normal(k7, (B4, D4), dtype=jnp.float32)
    target4 = jax.random.normal(k8, (B4, D4), dtype=jnp.float32) + 0.5
    loss5 = jax.block_until_ready(mmd_loss_rbf(source4, target4, _dk_cap=128))
    ref5 = _mmd_loss_rbf_ref(source4, target4)
    assert jnp.allclose(loss5, ref5, rtol=2e-3, atol=2e-4), (loss5, ref5)

    print("KERNEL_OK")
</pallas_src>

<mosaic_0001>
module attributes {stable_mosaic.version = 11 : i64} {
  func.func @_mmd_tile_kernel(%arg0: i32, %arg1: i32, %arg2: i32, %arg3: memref<1x5xf32, #tpu.memory_space<vmem>>, %arg4: memref<16x1xf32, #tpu.memory_space<vmem>>, %arg5: memref<1x16xf32, #tpu.memory_space<vmem>>, %arg6: memref<16x128xf32, #tpu.memory_space<vmem>>, %arg7: memref<16x128xf32, #tpu.memory_space<vmem>>, %arg8: memref<1x1x1xf32, #tpu.memory_space<vmem>>, %arg9: memref<1x1xf32, #tpu.memory_space<vmem>>) attributes {dimension_semantics = [#tpu.dimension_semantics<parallel>, #tpu.dimension_semantics<arbitrary>, #tpu.dimension_semantics<arbitrary>], iteration_bounds = array<i64: 1, 1, 1>, scalar_prefetch = 0 : i64, scratch_operands = 1 : i64, tpu.core_type = #tpu.core_type<tc>, window_params = [{pipeline_mode = #tpu.pipeline_mode<synchronous>, transform_indices = @transform_0, window_bounds = array<i64: 1, 5>}, {transform_indices = @transform_1, window_bounds = array<i64: 16, 1>}, {transform_indices = @transform_2, window_bounds = array<i64: 1, 16>}, {transform_indices = @transform_3, window_bounds = array<i64: 16, 128>}, {transform_indices = @transform_4, window_bounds = array<i64: 16, 128>}, {transform_indices = @transform_5, window_bounds = array<i64: 1, 1, 1>}]} {
    %c0_i32 = arith.constant 0 : i32
    %0 = arith.cmpi eq, %arg1, %c0_i32 : i32
    %c0_i32_0 = arith.constant 0 : i32
    %1 = arith.cmpi eq, %arg1, %c0_i32_0 : i32
    %2 = arith.extui %0 : i1 to i32
    %c0_i32_1 = arith.constant 0 : i32
    %3 = arith.cmpi ne, %2, %c0_i32_1 : i32
    scf.if %3 {
      %cst_25 = arith.constant 0.000000e+00 : f32
      %64 = vector.broadcast %cst_25 : f32 to vector<1x1xf32>
      %c0_26 = arith.constant 0 : index
      %c0_27 = arith.constant 0 : index
      %65 = vector.load %arg9[%c0_26, %c0_27] : memref<1x1xf32, #tpu.memory_space<vmem>>, vector<1x1xf32>
      tpu.vector_store %arg9[%c0_26, %c0_27], %64 {strides = array<i32>} : memref<1x1xf32, #tpu.memory_space<vmem>>, vector<1x1xf32>,
    } else {
    }
    %c0 = arith.constant 0 : index
    %c0_2 = arith.constant 0 : index
    %4 = vector.load %arg6[%c0, %c0_2] : memref<16x128xf32, #tpu.memory_space<vmem>>, vector<16x128xf32>
    %c0_3 = arith.constant 0 : index
    %c0_4 = arith.constant 0 : index
    %5 = vector.load %arg7[%c0_3, %c0_4] : memref<16x128xf32, #tpu.memory_space<vmem>>, vector<16x128xf32>
    %cst = arith.constant dense<0.000000e+00> : vector<16x16xf32>
    %6 = tpu.matmul %4, %5, %cst {dimension_numbers = #tpu.dot_dimension_numbers<[1], [1], [0], [0], [0, 0, 1, 0], [], []>} : vector<16x128xf32>, vector<16x128xf32>, vector<16x16xf32> -> vector<16x16xf32>
    %c0_5 = arith.constant 0 : index
    %c0_6 = arith.constant 0 : index
    %7 = vector.load %arg4[%c0_5, %c0_6] : memref<16x1xf32, #tpu.memory_space<vmem>>, vector<16x1xf32>
    %c0_7 = arith.constant 0 : index
    %c0_8 = arith.constant 0 : index
    %8 = vector.load %arg5[%c0_7, %c0_8] : memref<1x16xf32, #tpu.memory_space<vmem>>, vector<1x16xf32>
    %9 = vector.broadcast %7 : vector<16x1xf32> to vector<16x16xf32>
    %10 = vector.broadcast %8 : vector<1x16xf32> to vector<16x16xf32>
    %11 = arith.addf %9, %10 : vector<16x16xf32>
    %cst_9 = arith.constant 2.000000e+00 : f32
    %12 = vector.broadcast %cst_9 : f32 to vector<16x16xf32>
    %13 = arith.mulf %12, %6 : vector<16x16xf32>
    %14 = arith.subf %11, %13 : vector<16x16xf32>
    %cst_10 = arith.constant 0.000000e+00 : f32
    %15 = vector.broadcast %cst_10 : f32 to vector<16x16xf32>
    %16 = arith.maximumf %14, %15 : vector<16x16xf32>
    %c0_11 = arith.constant 0 : index
    %c4 = arith.constant 4 : index
    %17 = vector.load %arg3[%c0_11, %c4] : memref<1x5xf32, #tpu.memory_space<vmem>>, vector<1x1xf32>
    %18 = vector.extract %17[0, 0] : f32 from vector<1x1xf32>
    %19 = vector.broadcast %18 : f32 to vector<16x16xf32>
    %20 = arith.mulf %16, %19 : vector<16x16xf32>
    %21 = math.exp %20 : vector<16x16xf32>
    %22 = arith.mulf %21, %21 : vector<16x16xf32>
    %23 = arith.addf %21, %22 : vector<16x16xf32>
    %24 = arith.mulf %22, %22 : vector<16x16xf32>
    %25 = arith.addf %23, %24 : vector<16x16xf32>
    %26 = arith.mulf %24, %24 : vector<16x16xf32>
    %27 = arith.addf %25, %26 : vector<16x16xf32>
    %28 = arith.mulf %26, %26 : vector<16x16xf32>
    %29 = arith.addf %27, %28 : vector<16x16xf32>
    %c16_i32 = arith.constant 16 : i32
    %30 = arith.muli %arg0, %c16_i32 : i32
    %31 = tpu.iota {dimensions = array<i32: 0>} : vector<16x16xi32>
    %32 = vector.broadcast %30 : i32 to vector<16x16xi32>
    %33 = arith.addi %32, %31 : vector<16x16xi32>
    %c16_i32_12 = arith.constant 16 : i32
    %34 = arith.muli %arg1, %c16_i32_12 : i32
    %35 = tpu.iota {dimensions = array<i32: 1>} : vector<16x16xi32>
    %36 = vector.broadcast %34 : i32 to vector<16x16xi32>
    %37 = arith.addi %36, %35 : vector<16x16xi32>
    %c8_i32 = arith.constant 8 : i32
    %38 = vector.broadcast %c8_i32 : i32 to vector<16x16xi32>
    %39 = arith.cmpi slt, %33, %38 : vector<16x16xi32>
    %c8_i32_13 = arith.constant 8 : i32
    %40 = vector.broadcast %c8_i32_13 : i32 to vector<16x16xi32>
    %41 = arith.cmpi slt, %37, %40 : vector<16x16xi32>
    %42 = arith.xori %39, %41 : vector<16x16xi1>
    %cst_14 = arith.constant -1.000000e+00 : f32
    %cst_15 = arith.constant 1.000000e+00 : f32
    %43 = vector.broadcast %cst_14 : f32 to vector<16x16xf32>
    %44 = vector.broadcast %cst_15 : f32 to vector<16x16xf32>
    %45 = arith.select %42, %43, %44 : vector<16x16xi1>, vector<16x16xf32>
    %c16_i32_16 = arith.constant 16 : i32
    %46 = vector.broadcast %c16_i32_16 : i32 to vector<16x16xi32>
    %47 = arith.cmpi slt, %33, %46 : vector<16x16xi32>
    %c16_i32_17 = arith.constant 16 : i32
    %48 = vector.broadcast %c16_i32_17 : i32 to vector<16x16xi32>
    %49 = arith.cmpi slt, %37, %48 : vector<16x16xi32>
    %50 = arith.andi %47, %49 : vector<16x16xi1>
    %cst_18 = arith.constant 0.000000e+00 : f32
    %51 = vector.broadcast %cst_18 : f32 to vector<16x16xf32>
    %52 = arith.select %50, %45, %51 : vector<16x16xi1>, vector<16x16xf32>
    %c0_19 = arith.constant 0 : index
    %c0_20 = arith.constant 0 : index
    %53 = vector.load %arg9[%c0_19, %c0_20] : memref<1x1xf32, #tpu.memory_space<vmem>>, vector<1x1xf32>
    %54 = arith.mulf %29, %52 : vector<16x16xf32>
    %55 = vector.shape_cast %54 : vector<16x16xf32> to vector<1x16x16xf32>
    %cst_21 = arith.constant dense<0.000000e+00> : vector<1xf32>
    %56 = vector.multi_reduction <add>, %55, %cst_21 [1, 2] : vector<1x16x16xf32> to vector<1xf32>
    %57 = vector.shape_cast %56 : vector<1xf32> to vector<1x1x1xf32>
    %58 = vector.extract %57[0, 0, 0] : f32 from vector<1x1x1xf32>
    %59 = vector.broadcast %58 : f32 to vector<1x1xf32>
    %60 = arith.addf %53, %59 : vector<1x1xf32>
    %c0_22 = arith.constant 0 : index
    %c0_23 = arith.constant 0 : index
    %61 = vector.load %arg9[%c0_22, %c0_23] : memref<1x1xf32, #tpu.memory_space<vmem>>, vector<1x1xf32>
    tpu.vector_store %arg9[%c0_22, %c0_23], %60 {strides = array<i32>} : memref<1x1xf32, #tpu.memory_space<vmem>>, vector<1x1xf32>,
    %62 = arith.extui %1 : i1 to i32
    %c0_i32_24 = arith.constant 0 : i32
    %63 = arith.cmpi ne, %62, %c0_i32_24 : i32
    scf.if %63 {
      %c0_25 = arith.constant 0 : index
      %c0_26 = arith.constant 0 : index
      %64 = vector.load %arg9[%c0_25, %c0_26] : memref<1x1xf32, #tpu.memory_space<vmem>>, vector<1x1xf32>
      %65 = vector.shape_cast %64 : vector<1x1xf32> to vector<1x1x1xf32>
      %c0_27 = arith.constant 0 : index
      %c0_28 = arith.constant 0 : index
      %c0_29 = arith.constant 0 : index
      %66 = vector.load %arg8[%c0_27, %c0_28, %c0_29] : memref<1x1x1xf32, #tpu.memory_space<vmem>>, vector<1x1x1xf32>
      tpu.vector_store %arg8[%c0_27, %c0_28, %c0_29], %65 {strides = array<i32>} : memref<1x1x1xf32, #tpu.memory_space<vmem>>, vector<1x1x1xf32>,
    } else {
    }
    return
  }
  func.func @transform_0(%arg0: i32, %arg1: i32, %arg2: i32) -> (i32, i32) {
    %c0_i32 = arith.constant 0 : i32
    %c0_i32_0 = arith.constant 0 : i32
    %c0_i32_1 = arith.constant 0 : i32
    return %c0_i32, %c0_i32_0 : i32, i32
  }
  func.func @transform_1(%arg0: i32, %arg1: i32, %arg2: i32) -> (i32, i32) {
    %c0_i32 = arith.constant 0 : i32
    %c0_i32_0 = arith.constant 0 : i32
    return %arg0, %c0_i32 : i32, i32
  }
  func.func @transform_2(%arg0: i32, %arg1: i32, %arg2: i32) -> (i32, i32) {
    %c0_i32 = arith.constant 0 : i32
    %c0_i32_0 = arith.constant 0 : i32
    return %c0_i32, %arg1 : i32, i32
  }
  func.func @transform_3(%arg0: i32, %arg1: i32, %arg2: i32) -> (i32, i32) {
    %c0_i32 = arith.constant 0 : i32
    return %arg0, %arg2 : i32, i32
  }
  func.func @transform_4(%arg0: i32, %arg1: i32, %arg2: i32) -> (i32, i32) {
    %c0_i32 = arith.constant 0 : i32
    return %arg1, %arg2 : i32, i32
  }
  func.func @transform_5(%arg0: i32, %arg1: i32, %arg2: i32) -> (i32, i32, i32) {
    %c0_i32 = arith.constant 0 : i32
    %c0_i32_0 = arith.constant 0 : i32
    %c0_i32_1 = arith.constant 0 : i32
    return %arg0, %c0_i32, %c0_i32_0 : i32, i32, i32
  }
}

</mosaic_0001>

<bundles_post_ra>
// kernel: tpu_custom_call.1
= control target key start
LH: loop header
LB: loop body
LE: loop exit
PB: predicated region body
PF: predicated region fallthrough
CT: control target
= control target key end

     0   :  { %10 = vsyncpa [#allocation4], 0  ;;  %s454_s0 = inlined_call_operand.hbm [shape: f32[1,5], index: 0, kind: input, shape index: {}]   ;;  %s455_s1 = inlined_call_operand.vmem [shape: f32[16,1], index: 1, kind: input, shape index: {}]   ;;  %s456_s2 = inlined_call_operand.hbm [shape: f32[1,16], index: 2, kind: input, shape index: {}]   ;;  %s457_s3 = inlined_call_operand.vmem [shape: f32[16,128], index: 3, kind: input, shape index: {}]   ;;  %s458_s4 = inlined_call_operand.vmem [shape: f32[16,128], index: 4, kind: input, shape index: {}]   ;;  %s459_s5 = inlined_call_operand.hbm [shape: f32[1,1,1], index: 5, kind: output, shape index: {}]  }
   0x1   :  { %11 = vsyncpa [#allocation7], 0 }
   0x2   :  { %12 = vsyncpa [#allocation5], 0  ;;  %s359_s18 = smov [#allocation3]   ;;  %s360_s20 = smov [#allocation6]  }
   0x3   :  { %s19_s19 = sshll.u32 %s359_s18, 4  ;;  %s31_s21 = sshll.u32 %s360_s20, 4  ;;  %s20_s19 = int_to_ptr.vmem [resolvable:$true] %s19_s19  ;;  %s32_s21 = int_to_ptr.vmem [resolvable:$true] %s31_s21 }
   0x4   :  { %s287_s24 = scalar_lea.hbm %s454_s0, 16 }
   0x5   :  { %p288_p0 = scmp.ne.s32.totalorder %s454_s0, %s287_s24  ;;  %p291_p1 = scmp.lt.u32.totalorder %s287_s24, %s454_s0 }
   0x7   :  { %p293_p2 = pnand %p291_p1, %p288_p0 }
   0x9   :  { %296 = shalt.err (!%p293_p2)
}
   0xa   :  { %s297_s29 = scalar_lea.vmem %s20_s19, 16  ;;  %s301_s30 = scalar_lea.vmem %s20_s19, 32 }
   0xb   :  { %p298_p3 = scmp.ne.s32.totalorder %s20_s19, %s297_s29  ;;  %p302_p4 = scmp.lt.s32.totalorder %s20_s19, %s20_s19 }
   0xc   :  { %p303_p5 = scmp.lt.s32.totalorder %s301_s30, %s297_s29 }
   0xe   :  { %p304_p6 = por %p303_p5, %p302_p4 }
  0x10   :  { %p305_p7 = pnand %p304_p6, %p298_p3 }
  0x12   :  { %308 = shalt.err (!%p305_p7)
}
  0x13   :  { %22 = dma.hbm_to_vmem [thread:$0]  %s454_s0, 16, %s20_s19, [#allocation4]  }
  0x14   :  { %s309_s10 = scalar_lea.hbm %s456_s2, 16 }
  0x15   :  { %p310_p8 = scmp.ne.s32.totalorder %s456_s2, %s309_s10  ;;  %p313_p9 = scmp.lt.u32.totalorder %s309_s10, %s456_s2 }
  0x17   :  { %p315_p10 = pnand %p313_p9, %p310_p8 }
  0x19   :  { %318 = shalt.err (!%p315_p10)
}
  0x1a   :  { %s319_s15 = scalar_lea.vmem %s32_s21, 16  ;;  %s323_s16 = scalar_lea.vmem %s32_s21, 32 }
  0x1b   :  { %p320_p11 = scmp.ne.s32.totalorder %s32_s21, %s319_s15  ;;  %p324_p12 = scmp.lt.s32.totalorder %s32_s21, %s32_s21 }
  0x1c   :  { %p325_p13 = scmp.lt.s32.totalorder %s323_s16, %s319_s15 }
  0x1e   :  { %p326_p0 = por %p325_p13, %p324_p12 }
  0x20   :  { %p327_p1 = pnand %p326_p0, %p320_p11 }
  0x22   :  { %330 = shalt.err (!%p327_p1)
}
  0x23   :  { %34 = dma.hbm_to_vmem [thread:$0]  %s456_s2, 16, %s32_s21, [#allocation7]  }
  0x24   :  { %353 = dma.done.wait [#allocation4], 16  }
  0x25   :  { %354 = vsyncadd [#allocation4], 4294967280 }
  0x26   :  { %355 = dma.done.wait [#allocation7], 16  }
  0x27   :  { %356 = vsyncadd [#allocation7], 4294967280  ;;  %v361_v0 = vmov 0   ;;  %v53_v1 = vld [vmem:[%s458_s4] sm:$0xff]  ;;  %v54_v2 = vld [vmem:[%s458_s4 + $0x8] sm:$0xff]  ;;  %s362_s25 = smov 124   ;;  %v194_v28 = vlaneseq }
  0x28   :  { %282 = vset.pattern.permute.xlu1 %v361_v0  ;;  %281 = vset.pattern.permute.xlu0 %v361_v0  ;;  %v51_v3 = vld [vmem:[%s457_s3] sm:$0xff]  ;;  %v265_v4 = vpack.c.bf16 %v54_v2, %v53_v1  ;;  %v131_v6 = vld [vmem:[%s455_s1 + $0x8] sm:$0xff]  ;;  %vm363_vm1 = vmmov 1   ;;  %v364_v40 = vmov 1.0   ;;  %vm215_vm4 = vcmask 130048  }
  0x29   :  { %262 = vmatprep.mubr.f32.mxu0 %v51_v3  ;;  %v157_v5 = vld [vmem:[#allocation3] sm:$0x1]  ;;  %140 = vperm.xlu1 %282, %v131_v6   ;;  %v52_v8 = vld [vmem:[%s457_s3 + $0x8] sm:$0xff]  ;;  %v253_v10 = vld [vmem:[#allocation6] ss:$0 sm:$0xff]  ;;  %v195_v29 = vand.u32 127, %v194_v28 }
  0x2a   :  { %159 = vrot.lane.b32.xlu0 %v157_v5, %s362_s25  ;;  %266 = vmatprep.subr.bf16.mxu0 %v265_v4  ;;  %v130_v7 = vld [vmem:[%s455_s1] sm:$0xff]  ;;  %vm49_vm5 = vcmask 0   ;;  %v365_v58 = vmov 0.0   ;;  %s366_s3 = smov [#allocation8]  }
  0x2b   :  { %268 = vmatpush3.bf16.xpose.msra.mxu0 %v265_v4  ;;  %vm200_vm0 = vcmp.lt.s32.totalorder %v195_v29, 8  ;;  %vm207_vm3 = vcmp.lt.s32.totalorder %v195_v29, 16  ;;  %50 = vst.msk [vmem:[#allocation2] sm:$0x1] %vm49_vm5, %v365_v58  ;;  %s243_s30 = sshll.u32 %s366_s3, 4  ;;  %s244_s30 = int_to_ptr.vmem [resolvable:$true] %s243_s30 }
  0x2c   :  { %vm201_vm2 = vmxor %vm363_vm1, %vm200_vm0  ;;  %v204_v41 = vsel %vm200_vm0, -1.0, %v364_v40  ;;  %s331_s6 = scalar_lea.vmem %s244_s30, 16  ;;  %s335_s7 = scalar_lea.vmem %s244_s30, 32 }
  0x2d   :  { %v203_v44 = vsel %vm201_vm2, -1.0, %v364_v40  ;;  %v211_v49 = vsel %vm207_vm3, %v204_v41, 0.0  ;;  %p332_p2 = scmp.ne.s32.totalorder %s244_s30, %s331_s6  ;;  %p336_p3 = scmp.lt.s32.totalorder %s244_s30, %s244_s30 }
  0x2e   :  { %135 = vperm.xlu0 %281, %v130_v7   ;;  %v210_v51 = vsel %vm207_vm3, %v203_v44, 0.0  ;;  %p337_p4 = scmp.lt.s32.totalorder %s335_s7, %s331_s6 }
  0x30   :  { %p338_p5 = por %p337_p4, %p336_p3 }
  0x32   :  { %263 = vmatmul.mubr.f32.vlgmr.msra.gmra.mrb[0].mxu0 %v52_v8  ;;  %v212_v2 = vld [vmem:[#allocation2] sm:$0x1]  ;;  %p339_p6 = pnand %p338_p5, %p332_p2 }
  0x9c   :  { %v160_v9 = vpop.permute.xlu0 %159 }
  0x9d   :  { %269 = vpush %v160_v9 }
  0xa8   :  { %v141_v11 = vpop.permute.xlu1 %140 }
  0xa9   :  { %v150_v13 = vadd.f32 %v253_v10, %v141_v11 }
  0xad   :  { %v136_v12 = vpop.permute.xlu0 %135 }
  0xae   :  { %v149_v15 = vadd.f32 %v253_v10, %v136_v12 }
  0xce   :  { %s270_s29 = spop %269 }
  0xcf   :  { %v163_v21 = vstv %s270_s29 }
 0x105   :  { %v264_v14 = vpop.f32.mrb[0].mxu0 }
 0x106   :  { %v152_v16 = vmul.f32 2.0, %v264_v14  ;;  %v121_v17 = vpop.f32.mrb[1].mxu0 }
 0x107   :  { %v151_v18 = vmul.f32 2.0, %v121_v17 }
 0x108   :  { %v154_v19 = vsub.f32 %v150_v13, %v152_v16 }
 0x109   :  { %v153_v20 = vsub.f32 %v149_v15, %v151_v18 }
 0x10a   :  { %v156_v22 = vmax.f32 %v154_v19, 0.0 }
 0x10b   :  { %v155_v23 = vmax.f32 %v153_v20, 0.0 }
 0x10c   :  { %v165_v24 = vmul.f32 %v163_v21, %v156_v22 }
 0x10d   :  { %v164_v25 = vmul.f32 %v163_v21, %v155_v23 }
 0x10e   :  { %v168_v26 = vmul.f32 1.442695, %v165_v24 }
 0x10f   :  { %v166_v27 = vmul.f32 1.442695, %v164_v25 }
 0x110   :  { %283 = vpow2.f32 %v168_v26 }
 0x111   :  { %285 = vpow2.f32 %v166_v27 }
 0x11a   :  { %v284_v30 = vpop.eup %283 }
 0x11b   :  { %v286_v31 = vpop.eup %285  ;;  %v171_v32 = vmul.f32 %v284_v30, %v284_v30 }
 0x11c   :  { %v170_v33 = vmul.f32 %v286_v31, %v286_v31 }
 0x11d   :  { %v173_v34 = vadd.f32 %v284_v30, %v171_v32  ;;  %v175_v35 = vmul.f32 %v171_v32, %v171_v32 }
 0x11e   :  { %v172_v36 = vadd.f32 %v286_v31, %v170_v33  ;;  %v174_v37 = vmul.f32 %v170_v33, %v170_v33 }
 0x11f   :  { %v177_v38 = vadd.f32 %v175_v35, %v173_v34  ;;  %v179_v39 = vmul.f32 %v175_v35, %v175_v35 }
 0x120   :  { %v176_v42 = vadd.f32 %v174_v37, %v172_v36  ;;  %v178_v43 = vmul.f32 %v174_v37, %v174_v37 }
 0x121   :  { %v181_v45 = vadd.f32 %v179_v39, %v177_v38  ;;  %v183_v46 = vmul.f32 %v179_v39, %v179_v39 }
 0x122   :  { %v180_v47 = vadd.f32 %v178_v43, %v176_v42  ;;  %v182_v48 = vmul.f32 %v178_v43, %v178_v43 }
 0x123   :  { %v185_v50 = vadd.f32 %v183_v46, %v181_v45 }
 0x124   :  { %v184_v52 = vadd.f32 %v182_v48, %v180_v47 }
 0x125   :  { %v214_v53 = vmul.f32 %v211_v49, %v185_v50 }
 0x126   :  { %v213_v54 = vmul.f32 %v210_v51, %v184_v52 }
 0x127   :  { %v217_v55 = vsel %vm215_vm4, %v214_v53, 0.0 }
 0x128   :  { %v216_v56 = vsel %vm215_vm4, %v213_v54, 0.0 }
 0x129   :  { %v218_v57 = vadd.f32 %v217_v55, %v216_v56 }
 0x12b   :  { %219 = vadd.xlane.f32.xlu1 %v218_v57 }
 0x1b8   :  { %v220_v59 = vpop.xlane.xlu1 %219 }
 0x1b9   :  { %v221_v60 = vrot.slane %v220_v59, 4 }
 0x1bb   :  { %v222_v61 = vadd.f32 %v221_v60, %v220_v59 }
 0x1bd   :  { %v223_v62 = vrot.slane %v222_v61, 2 }
 0x1bf   :  { %v224_v63 = vadd.f32 %v223_v62, %v222_v61 }
 0x1c1   :  { %v225_v0 = vrot.slane %v224_v63, 1 }
 0x1c3   :  { %v226_v1 = vadd.f32 %v225_v0, %v224_v63 }
 0x1c5   :  { %271 = vpush %v226_v1 }
 0x1f6   :  { %s272_s1 = spop %271 }
 0x1f7   :  { %v228_v3 = vstv %s272_s1 }
 0x1f8   :  { %v229_v4 = vadd.f32 %v228_v3, %v212_v2 }
 0x1fa   :  { %231 = vst.msk [vmem:[#allocation2] sm:$0x1] %vm49_vm5, %v229_v4 }
 0x201   :  { %v235_v5 = vld [vmem:[#allocation2] sm:$0x1] }
 0x202   :  { %236 = vst.msk [vmem:[#allocation8] sm:$0x1] %vm49_vm5, %v235_v5 }
 0x203   :  { %342 = shalt.err (!%p339_p6)
}
 0x204   :  { %s343_s10 = scalar_lea.hbm %s459_s5, 16 }
 0x205   :  { %p344_p7 = scmp.ne.s32.totalorder %s459_s5, %s343_s10  ;;  %p347_p8 = scmp.lt.u32.totalorder %s343_s10, %s459_s5 }
 0x207   :  { %p349_p9 = pnand %p347_p8, %p344_p7 }
 0x209   :  { %352 = shalt.err (!%p349_p9)
}
 0x20a   :  { %246 = dma.vmem_to_hbm [thread:$0]  %s244_s30, 16, %s459_s5, [#allocation5]  }
 0x20b   :  { %357 = dma.done.wait [#allocation5], 16  }
 0x20c   :  { %358 = vsyncadd [#allocation5], 4294967280 }
 0x20d   :  { %250 = vsyncpa [#allocation4], 1 }
 0x20e   :  { %251 = vsyncpa [#allocation7], 1 }
 0x20f   :  { %252 = vsyncpa [#allocation5], 1 }

</bundles_post_ra>
